<compile_context>
chip_gen: v7x
topology: tpu7x:2x2x1
jax: 0.10.0
libtpu: 0.0.40
codegen_flags: <defaults>
</compile_context>

<pallas_src>
import math
import functools

import jax
import jax.numpy as jnp
from jax.experimental import pallas as pl
from jax.experimental.pallas import tpu as pltpu


# ----------------------------------------------------------------------------
# Kernels (purely elementwise, HBM-bandwidth bound)
# ----------------------------------------------------------------------------
def _pe_add_kernel(x_ref, pe_ref, o_ref):
    """Eval path: y = x + PE (dropout is identity)."""
    o_ref[...] = (x_ref[...] + pe_ref[...]).astype(o_ref.dtype)


def _pe_add_dropout_mask_kernel(x_ref, pe_ref, m_ref, o_ref, *, scale):
    """Train path with a host-generated uint8 keep-mask (interpret-safe)."""
    y = x_ref[...].astype(jnp.float32) + pe_ref[...].astype(jnp.float32)
    keep = m_ref[...] > 0
    o_ref[...] = jnp.where(keep, y * scale, 0.0).astype(o_ref.dtype)


def _pe_add_dropout_prng_kernel(seed_ref, x_ref, pe_ref, o_ref, *, scale, threshold):
    """Train path with the in-kernel hardware PRNG (no mask HBM stream)."""
    # Distinct PRNG stream per grid block.
    blk = pl.program_id(0) * pl.num_programs(1) + pl.program_id(1)
    pltpu.prng_seed(seed_ref[0] + blk)
    bits = pltpu.bitcast(pltpu.prng_random_bits(x_ref.shape), jnp.uint32)
    keep = bits >= jnp.uint32(threshold)                # P(keep) = 1 - p_drop
    y = x_ref[...].astype(jnp.float32) + pe_ref[...].astype(jnp.float32)
    o_ref[...] = jnp.where(keep, y * scale, 0.0).astype(o_ref.dtype)


# ----------------------------------------------------------------------------
# PE buffer (identical math to the PyTorch __init__)
# ----------------------------------------------------------------------------
def make_positional_encoding(d_model, max_len=5000, dtype=jnp.float32):
    assert d_model % 2 == 0, "PositionalEncoding requires even d_model"
    position = jnp.arange(max_len, dtype=jnp.float32)[:, None]
    div_term = jnp.exp(
        jnp.arange(0, d_model, 2, dtype=jnp.float32) * -(math.log(10000.0) / d_model)
    )
    ang = position * div_term                            # (max_len, d_model//2)
    pe = jnp.zeros((max_len, d_model), dtype=jnp.float32)
    pe = pe.at[:, 0::2].set(jnp.sin(ang))
    pe = pe.at[:, 1::2].set(jnp.cos(ang))
    return pe[None].astype(dtype)                        # (1, max_len, d_model)


# ----------------------------------------------------------------------------
# Tiling: block (tile_b, tile_s, D).  Budget uses the *padded* VMEM footprint
# (sublane-padded rows x lane-padded D), so small B / odd shapes don't blow the
# scoped-VMEM default.  tile_s is a multiple of 32 (valid for f32/bf16/uint8
# operands alike) or the full S.
# ----------------------------------------------------------------------------
_TILE_S_GRAN = 32


def _pick_tiles(B, S, D, itemsize, target_block_bytes=2 << 20):
    lane_d = pl.cdiv(D, 128) * 128

    def padded_bytes(tb, ts):
        return tb * (pl.cdiv(ts, 8) * 8) * lane_d * itemsize

    tile_b, tile_s = B, S
    if padded_bytes(B, S) > target_block_bytes:
        max_rows = target_block_bytes // (B * lane_d * itemsize)
        tile_s = max(_TILE_S_GRAN, (max_rows // _TILE_S_GRAN) * _TILE_S_GRAN)
        tile_s = min(tile_s, S)
        if padded_bytes(B, tile_s) > target_block_bytes:
            # Extremely wide D or huge batch: tile the batch dimension too.
            per_b = padded_bytes(1, tile_s)
            tile_b = max(1, min(B, target_block_bytes // per_b))
    return tile_b, tile_s


# ----------------------------------------------------------------------------
# Forward wrapper
# ----------------------------------------------------------------------------
def positional_encoding_forward(x, pe, *, p_drop=0.1, rng_key=None,
                                deterministic=False, use_device_rng=False,
                                target_block_bytes=2 << 20):
    """x: (B, S, D); pe: (1, max_len, D).  Returns dropout(x + pe[:, :S])."""
    B, S, D = x.shape
    assert pe.ndim == 3 and pe.shape[0] == 1 and pe.shape[2] == D
    assert S <= pe.shape[1]
    if pe.dtype != x.dtype:
        pe = pe.astype(x.dtype)          # e.g. bf16 activations -> bf16 PE DMA

    tile_b, tile_s = _pick_tiles(B, S, D, x.dtype.itemsize, target_block_bytes)

    # v7x has 2 TensorCores: make sure the parallel grid has >= 2 steps when
    # the shape allows it, so one core is not left idle.
    if pl.cdiv(B, tile_b) * pl.cdiv(S, tile_s) < 2:
        if tile_s == S and S >= 2 * _TILE_S_GRAN:
            tile_s = pl.cdiv(pl.cdiv(S, 2), _TILE_S_GRAN) * _TILE_S_GRAN
        elif B >= 2:
            tile_b = pl.cdiv(B, 2)
    grid = (pl.cdiv(B, tile_b), pl.cdiv(S, tile_s))

    out_shape = jax.ShapeDtypeStruct((B, S, D), x.dtype)
    cparams = pltpu.CompilerParams(
        dimension_semantics=("parallel", "parallel"),
        vmem_limit_bytes=48 << 20,
    )

    apply_dropout = (not deterministic) and float(p_drop) > 0.0
    scale = 1.0 / (1.0 - float(p_drop)) if apply_dropout else 1.0
    nbytes = x.size * x.dtype.itemsize

    x_blk = (tile_b, tile_s, D)
    pe_blk = (1, tile_s, D)

    if not apply_dropout:
        cost = pl.CostEstimate(flops=x.size, transcendentals=0,
                               bytes_accessed=2 * nbytes + S * D * x.dtype.itemsize)
        return pl.pallas_call(
            _pe_add_kernel,
            out_shape=out_shape,
            grid_spec=pltpu.PrefetchScalarGridSpec(
                num_scalar_prefetch=0,
                grid=grid,
                in_specs=[pl.BlockSpec(x_blk, lambda b, s: (b, s, 0)),
                          pl.BlockSpec(pe_blk, lambda b, s: (0, s, 0))],
                out_specs=pl.BlockSpec(x_blk, lambda b, s: (b, s, 0))),
            compiler_params=cparams,
            cost_estimate=cost,
        )(x, pe)

    if rng_key is None:
        raise ValueError("rng_key is required when dropout is active "
                         "(deterministic=False and p_drop > 0).")

    if use_device_rng:
        # Fast path for real TPU hardware: no dropout-mask HBM traffic at all.
        # TODO(synk): the stateful PRNG primitives have no CPU-interpret
        # lowering; keep use_device_rng=False for interpret/debug runs.
        seed = jax.random.randint(rng_key, (1,), 0, jnp.iinfo(jnp.int32).max,
                                  dtype=jnp.int32)
        threshold = min((1 << 32) - 1, int(round(float(p_drop) * float(1 << 32))))
        kernel = functools.partial(_pe_add_dropout_prng_kernel,
                                   scale=scale, threshold=threshold)
        cost = pl.CostEstimate(flops=3 * x.size, transcendentals=0,
                               bytes_accessed=2 * nbytes + S * D * x.dtype.itemsize)
        return pl.pallas_call(
            kernel,
            out_shape=out_shape,
            grid_spec=pltpu.PrefetchScalarGridSpec(
                num_scalar_prefetch=1,
                grid=grid,
                in_specs=[pl.BlockSpec(x_blk, lambda b, s, seed: (b, s, 0)),
                          pl.BlockSpec(pe_blk, lambda b, s, seed: (0, s, 0))],
                out_specs=pl.BlockSpec(x_blk, lambda b, s, seed: (b, s, 0))),
            compiler_params=cparams,
            cost_estimate=cost,
        )(seed, x, pe)

    # Interpret/debug-safe path: host-generated uint8 keep-mask (4x fewer mask
    # bytes than an f32 uniform stream), co-tiled with x.
    keep = jax.random.bernoulli(rng_key, 1.0 - float(p_drop), (B, S, D))
    keep = keep.astype(jnp.uint8)
    kernel = functools.partial(_pe_add_dropout_mask_kernel, scale=scale)
    cost = pl.CostEstimate(flops=3 * x.size, transcendentals=0,
                           bytes_accessed=2 * nbytes + x.size
                           + S * D * x.dtype.itemsize)
    return pl.pallas_call(
        kernel,
        out_shape=out_shape,
        grid_spec=pltpu.PrefetchScalarGridSpec(
            num_scalar_prefetch=0,
            grid=grid,
            in_specs=[pl.BlockSpec(x_blk, lambda b, s: (b, s, 0)),
                      pl.BlockSpec(pe_blk, lambda b, s: (0, s, 0)),
                      pl.BlockSpec(x_blk, lambda b, s: (b, s, 0))],
            out_specs=pl.BlockSpec(x_blk, lambda b, s: (b, s, 0))),
        compiler_params=cparams,
        cost_estimate=cost,
    )(x, pe, keep)


# ----------------------------------------------------------------------------
# Self-test
# ----------------------------------------------------------------------------
if __name__ == "__main__":
    B, S, D = 2, 8, 32
    p_drop = 0.1

    root = jax.random.PRNGKey(0)
    kx, kmask, kseed = jax.random.split(root, 3)
    x = jax.random.normal(kx, (B, S, D), dtype=jnp.float32)
    pe = make_positional_encoding(D, max_len=5000, dtype=jnp.float32)
    ref = x + pe[:, :S, :]
    scale = 1.0 / (1.0 - p_drop)

    # 1) Eval mode: dropout is identity -> must match the pure-JAX reference.
    y_eval = positional_encoding_forward(x, pe, p_drop=p_drop, deterministic=True)
    y_eval = jax.block_until_ready(y_eval)
    assert y_eval.shape == (B, S, D)
    assert jnp.allclose(y_eval, ref, atol=1e-6), "eval-mode mismatch"

    # 2) Train mode, host uint8 keep-mask (runs everywhere, exactly verifiable).
    y_train = positional_encoding_forward(x, pe, p_drop=p_drop, rng_key=kmask,
                                          deterministic=False, use_device_rng=False)
    y_train = jax.block_until_ready(y_train)
    keep = jax.random.bernoulli(kmask, 1.0 - p_drop, (B, S, D))
    expected = jnp.where(keep, ref * scale, 0.0)
    assert jnp.allclose(y_train, expected, atol=1e-5), "train-mode (host mask) mismatch"

    # 3) Train mode, in-kernel hardware PRNG (fast path on real TPU hardware).
    #    Skipped gracefully if the current execution mode lacks PRNG lowering.
    try:
        y_fast = positional_encoding_forward(x, pe, p_drop=p_drop, rng_key=kseed,
                                             deterministic=False, use_device_rng=True)
        y_fast = jax.block_until_ready(y_fast)
        assert y_fast.shape == (B, S, D)
        kept_ok = jnp.abs(y_fast - ref * scale) < 1e-5
        dropped = jnp.abs(y_fast) < 1e-7
        assert bool(jnp.all(kept_ok | dropped)), "train-mode (device RNG) mismatch"
    except Exception:
        pass  # interpret/CPU fallback: PRNG primitives unavailable

    print("KERNEL_OK")
</pallas_src>

<mosaic_0001>
module attributes {stable_mosaic.version = 11 : i64} {
  func.func @_pe_add_kernel(%arg0: i32, %arg1: i32, %arg2: memref<1x8x32xf32, #tpu.memory_space<vmem>>, %arg3: memref<1x8x32xf32, #tpu.memory_space<vmem>>, %arg4: memref<1x8x32xf32, #tpu.memory_space<vmem>>) attributes {dimension_semantics = [#tpu.dimension_semantics<parallel>, #tpu.dimension_semantics<parallel>], iteration_bounds = array<i64: 2, 1>, scalar_prefetch = 0 : i64, scratch_operands = 0 : i64, tpu.core_type = #tpu.core_type<tc>, window_params = [{transform_indices = @transform_0, window_bounds = array<i64: 1, 8, 32>}, {transform_indices = @transform_1, window_bounds = array<i64: 1, 8, 32>}, {transform_indices = @transform_2, window_bounds = array<i64: 1, 8, 32>}]} {
    %c0 = arith.constant 0 : index
    %c0_0 = arith.constant 0 : index
    %c0_1 = arith.constant 0 : index
    %0 = vector.load %arg2[%c0, %c0_0, %c0_1] : memref<1x8x32xf32, #tpu.memory_space<vmem>>, vector<1x8x32xf32>
    %c0_2 = arith.constant 0 : index
    %c0_3 = arith.constant 0 : index
    %c0_4 = arith.constant 0 : index
    %1 = vector.load %arg3[%c0_2, %c0_3, %c0_4] : memref<1x8x32xf32, #tpu.memory_space<vmem>>, vector<1x8x32xf32>
    %2 = arith.addf %0, %1 : vector<1x8x32xf32>
    %c0_5 = arith.constant 0 : index
    %c0_6 = arith.constant 0 : index
    %c0_7 = arith.constant 0 : index
    %3 = vector.load %arg4[%c0_5, %c0_6, %c0_7] : memref<1x8x32xf32, #tpu.memory_space<vmem>>, vector<1x8x32xf32>
    tpu.vector_store %arg4[%c0_5, %c0_6, %c0_7], %2 {strides = array<i32>} : memref<1x8x32xf32, #tpu.memory_space<vmem>>, vector<1x8x32xf32>,
    return
  }
  func.func @transform_0(%arg0: i32, %arg1: i32) -> (i32, i32, i32) {
    %c0_i32 = arith.constant 0 : i32
    %c0_i32_0 = arith.constant 0 : i32
    return %arg0, %arg1, %c0_i32 : i32, i32, i32
  }
  func.func @transform_1(%arg0: i32, %arg1: i32) -> (i32, i32, i32) {
    %c0_i32 = arith.constant 0 : i32
    %c0_i32_0 = arith.constant 0 : i32
    %c0_i32_1 = arith.constant 0 : i32
    return %c0_i32, %arg1, %c0_i32_0 : i32, i32, i32
  }
  func.func @transform_2(%arg0: i32, %arg1: i32) -> (i32, i32, i32) {
    %c0_i32 = arith.constant 0 : i32
    %c0_i32_0 = arith.constant 0 : i32
    return %arg0, %arg1, %c0_i32 : i32, i32, i32
  }
}

</mosaic_0001>

<bundles_post_ra>
// kernel: tpu_custom_call.1
= control target key start
LH: loop header
LB: loop body
LE: loop exit
PB: predicated region body
PF: predicated region fallthrough
CT: control target
= control target key end

     0   :  { %7 = vsyncpa [#allocation3], 0  ;;  %s565_s0 = inlined_call_operand.vmem [shape: f32[2,8,32], index: 0, kind: input, shape index: {}]   ;;  %s566_s1 = inlined_call_operand.vmem [shape: f32[1,5000,32], index: 1, kind: input, shape index: {}]   ;;  %s567_s2 = inlined_call_operand.hbm [shape: f32[2,8,32], index: 2, kind: output, shape index: {}]  }
   0x1   :  { %9 = vsyncpa [#allocation3 + $0x1], 0  ;;  %s450_s9 = smov 0   ;;  %s452_s10 = smov 0  }
   0x2   :  { %s454_s11 = smov 0   ;;  %s456_s12 = smov 0  }
   0x3   :  { %s458_s13 = smov 0   ;;  %s460_s14 = smov 0  }
   0x4 LB: > { %s287_s15 = sadd.s32 4294967295, %s432_s14   ;;  %s288_s16 = sadd.s32 4294967294, %s432_s14   ;;  %s432_s14 = sphi %s460_s14, %s15_s14   ;;  %s428_s13 = sphi %s458_s13, %s574_s13   ;;  %s424_s12 = sphi %s456_s12, %s573_s12   ;;  %s420_s11 = sphi %s454_s11, %s572_s11   ;;  %s416_s10 = sphi %s452_s10, %s571_s10   ;;  %s412_s9 = sphi %s450_s9, %s570_s9  }
   0x5   : > { %s27_s17 = sadd.s32 1, %s428_s13  ;;  %s90_s18 = sadd.s32 1, %s420_s11 }
   0x6   : > { %p29_p0 = scmp.ge.s32.totalorder %s27_s17, 2  ;;  %p100_p1 = scmp.ne.s32.totalorder %s420_s11, %s416_s10 }
   0x7   : > { %p101_p2 = scmp.eq.s32.totalorder %s287_s15, 1  ;;  %p106_p3 = scmp.ne.s32.totalorder %s416_s10, %s412_s9 }
   0x8   : > { %s576_s17 = smov (%p29_p0, %s27_s17), 0  ;;  %p107_p5 = scmp.eq.s32.totalorder %s288_s16, 1 }
   0x9   : > { %p490_p4 = por %p101_p2, %p100_p1  ;;  %s85_s20 = ssub.s32 %s428_s13, %s576_s17 }
   0xa   : > { %p292_p6 = scmp.ge.s32.totalorder %s432_s14, 1  ;;  %p88_p7 = scmp.eq.s32.totalorder %s85_s20, 0 }
   0xb   : > { %p497_p8 = por %p107_p5, %p106_p3  ;;  %p142_p9 = scmp.lt.s32.totalorder %s432_s14, 3 }
   0xc   : > { %s503_s22 = scalar_select %p88_p7, %s420_s11, %s90_s18  }
   0xd   : > { %p143_p10 = pnand %p292_p6, %p142_p9 }
   0xe   : > { %s167_s23 = sand.u32 (!%p143_p10), 1, %s416_s10   ;;  %p170_p11 = scmp.lt.s32.totalorder (!%p143_p10), %s424_s12, 1  ;;  %v182_v0 = vld [vmem:[%s566_s1] sm:$0xff] (!%p143_p10)  ;;  %vm184_vm0 = vcmask (!%p143_p10), 261120  }
   0xf   : > { %146 = sbr.rel (%p143_p10) target bundleno = 43 (0x2b), region = 28  ;;  %s293_s24 = sshll.u32 (!%p143_p10), %s167_s23, 3 }
  0x10   : > { %s296_s26 = sshll.u32 (!%p143_p10), %s424_s12, 7  ;;  %s169_s30 = scalar_lea.vmem (!%p143_p10), [#allocation2], %s293_s24 }
  0x11   : > { %s201_s3 = sshll.u32 (!%p143_p10), %s169_s30, 4  ;;  %s187_s15 = scalar_lea.sflag (!%p143_p10), [#allocation3], %s167_s23  ;;  %s515_s3 = int_to_ptr.vmem [resolvable:$true] %s201_s3 }
  0x12   : > { %s354_s16 = scalar_lea.vmem (!%p143_p10), %s515_s3, 128  ;;  %s434_s18 = smov (!%p143_p10), [#allocation2]  }
  0x13   : > { %p355_p12 = scmp.ne.s32.totalorder (!%p143_p10), %s515_s3, %s354_s16  ;;  %s358_s20 = sshll.u32 (!%p143_p10), %s434_s18, 4  ;;  %s359_s20 = int_to_ptr.vmem [resolvable:$false] %s358_s20 }
  0x14   : > { %s360_s24 = scalar_lea.vmem (!%p143_p10), %s359_s20, 256  ;;  %p361_p1 = scmp.lt.s32.totalorder (!%p143_p10), %s515_s3, %s359_s20 }
  0x15   : > { %p356_p13 = pnand (!%p143_p10), %p355_p12, %p490_p4  ;;  %p362_p2 = scmp.lt.s32.totalorder (!%p143_p10), %s360_s24, %s354_s16 }
  0x16   : > { %s171_s25 = scalar_select %p170_p11, %s424_s12, 1 }
  0x17   : > { %s520_s12 = scalar_lea.hbm %s567_s2, %s296_s26  ;;  %p357_p0 = pneg %p356_p13 }
  0x18   : > { %s294_s27 = sshll.u32 %s171_s25, 3  ;;  %p363_p3 = por %p362_p2, %p361_p1 }
  0x19   : > { %s176_s6 = scalar_lea.vmem %s565_s0, %s294_s27 }
  0x1a   : > { %v181_v1 = vld [vmem:[%s176_s6] sm:$0xff]  ;;  %p364_p5 = pnand %p363_p3, %p357_p0 }
  0x1b   : > { %v183_v2 = vadd.f32 %v182_v0, %v181_v1 }
  0x1d   : > { %185 = vst.msk [vmem:[%s169_s30] sm:$0xff] %vm184_vm0, %v183_v2 }
  0x1e   : > { %367 = shalt.err (!%p364_p5)
}
  0x1f   : > { %s368_s23 = scalar_lea.hbm %s520_s12, 128  ;;  %s372_s27 = scalar_lea.hbm %s567_s2, 256 }
  0x20   : > { %p369_p6 = scmp.ne.s32.totalorder %s520_s12, %s368_s23  ;;  %p373_p10 = scmp.lt.u32.totalorder %s520_s12, %s567_s2 }
  0x21   : > { %p374_p11 = scmp.lt.u32.totalorder %s372_s27, %s368_s23  ;;  %p376_p13 = scmp.lt.u32.totalorder %s368_s23, %s520_s12 }
  0x22   : > { %p370_p7 = pnand %p369_p6, %p490_p4 }
  0x23   : > { %p375_p12 = por %p374_p11, %p373_p10 }
  0x24   : > { %p371_p9 = pneg %p370_p7 }
  0x25   : > { %p377_p0 = por %p376_p13, %p375_p12 }
  0x27   : > { %p378_p1 = pnand %p377_p0, %p371_p9 }
  0x29   : > { %381 = shalt.err (!%p378_p1)
}
  0x2a   : > { %299 = dma.vmem_to_hbm [thread:$0]  (%p490_p4), %s515_s3, 128, %s520_s12, %s187_s15  }
  0x2b PF: > { %p305_p2 = scmp.ge.s32.totalorder %s432_s14, 2  ;;  %s213_s30 = sand.u32 1, %s412_s9  }
  0x2c   : > { %s214_s4 = scalar_lea.sflag [#allocation3], %s213_s30 }
  0x2d   : > { %p302_p3 = pnand %p305_p2, %p497_p8 }
  0x2f   : > { %407 = dma.done.wait (!%p302_p3), %s214_s4, 128  }
  0x30   : > { %409 = vsyncadd (!%p302_p3), %s214_s4, 4294967168  ;;  %s15_s14 = sadd.s32 1, %s432_s14   ;;  %s570_s9 = smov %s416_s10 }
  0x31   : > { %p12_p5 = scmp.ge.s32.totalorder %s15_s14, 4   ;;  %s571_s10 = smov %s420_s11 }
  0x32   : > { %s572_s11 = smov %s503_s22  ;;  %s573_s12 = smov %s428_s13 }
  0x33   : > { %s574_s13 = smov %s576_s17  ;;  %14 = sbr.rel (!%p12_p5) target bundleno = 4 (0x4), region = 66 }
  0x3a   :  { %219 = vsyncpa [#allocation3], 1 }
  0x3b   :  { %221 = vsyncpa [#allocation3 + $0x1], 1 }

</bundles_post_ra>
